<compile_context>
chip_gen: v6e
topology: v6e:2x2x1
jax: 0.10.0
libtpu: 0.0.40
codegen_flags: <defaults>
</compile_context>

<pallas_src>
import jax
import jax.numpy as jnp
from jax.experimental import pallas as pl
from jax.experimental.pallas import tpu as pltpu


def ffn_kernel(x_ref, w1_ref, b1_ref, w2_ref, lnp_ref, o_ref):
    # x_ref: (TM, d_in)  w1_ref: (d_in, d_hid)  w2_ref: (d_hid, d_in)
    # b1_ref: (1, d_hid) lnp_ref: (3, d_in) = [b2; gamma; beta]
    x = x_ref[...]
    mm_dtype = w1_ref.dtype                      # bf16 fast path / f32 exact path
    precision = (jax.lax.Precision.HIGHEST
                 if mm_dtype == jnp.float32 else None)

    # ---- w_1 + ReLU (MXU, f32 accumulation; bias kept in f32) ----
    h = jnp.dot(x.astype(mm_dtype), w1_ref[...],
                preferred_element_type=jnp.float32, precision=precision)
    h = jnp.maximum(h + b1_ref[...], 0.0)

    # ---- w_2 (MXU, f32 accumulation) ----
    y = jnp.dot(h.astype(mm_dtype), w2_ref[...],
                preferred_element_type=jnp.float32, precision=precision)

    lnp = lnp_ref[...]
    y = y + lnp[0:1, :]                          # + b2

    # TODO(synk): nn.Dropout(p=0.1) is identity in eval mode; training-mode
    # stochastic dropout (pltpu.prng_* + mask) is not applied here.

    # ---- residual add + LayerNorm over last dim (f32, eps = 1e-6) ----
    y = y + x.astype(jnp.float32)
    mean = jnp.mean(y, axis=-1, keepdims=True)
    centered = y - mean
    var = jnp.mean(centered * centered, axis=-1, keepdims=True)
    y = centered * jax.lax.rsqrt(var + 1e-6)
    y = y * lnp[1:2, :] + lnp[2:3, :]            # * gamma + beta

    o_ref[...] = y.astype(o_ref.dtype)


def _round_up(n, m):
    return ((n + m - 1) // m) * m


def positionwise_ffn(x, w1, b1, w2, b2, gamma, beta, *,
                     tm=None, param_dtype=jnp.bfloat16, io_dtype=None):
    """x: (B, S, d_in). Returns (B, S, d_in) in x.dtype.

    tm:          row (token) tile; default is generation-aware (512 on
                 128-MiB-VMEM parts, 256 on v7x), shrunk automatically.
    param_dtype: dtype of W1/W2 fed to the MXU (bf16 = native fast path,
                 jnp.float32 = bit-accurate vs. the f32 reference).
    io_dtype:    optional streaming dtype for x / out (e.g. bf16 when the
                 layer is memory-bound and d_in is a multiple of 128);
                 residual / LayerNorm math stays f32 in-kernel.
    """
    B, S, d_in = x.shape
    d_hid = w1.shape[1]
    M = B * S

    io_dtype = x.dtype if io_dtype is None else jnp.dtype(io_dtype)
    itemsize_x = jnp.dtype(io_dtype).itemsize
    itemsize_p = jnp.dtype(param_dtype).itemsize

    # --- generation-aware VMEM budget (leave headroom for Mosaic scratch) ---
    try:
        vmem_cap = int(pltpu.get_tpu_info().vmem_capacity_bytes)
    except Exception:
        vmem_cap = 64 << 20                       # conservative (v7x-sized)
    vmem_budget = max(vmem_cap - (12 << 20), 16 << 20)

    # --- row tile: big on 128-MiB parts, 256 on v7x; sublane-aligned ---
    if tm is None:
        tm = 512 if vmem_cap >= (100 << 20) else 256
    row_align = 8 * 4 // itemsize_x               # f32: 8, bf16: 16, i8/fp8: 32
    tm_eff = min(tm, _round_up(M, row_align))
    # Guarantee >= 2 grid steps when possible so both v7x TensorCores get work.
    if M > row_align and pl.cdiv(M, tm_eff) < 2:
        tm_eff = _round_up(pl.cdiv(M, 2), row_align)

    def vmem_est(t):
        return (2 * d_in * d_hid * itemsize_p      # W1 + W2 (Buffered(1))
                + (d_hid + 3 * d_in) * 4           # b1 + packed (b2,gamma,beta)
                + 2 * 2 * t * d_in * itemsize_x    # x & out tiles, 2 buffers each
                + t * d_hid * (4 + itemsize_p)     # h (f32) + mm-dtype cast of h
                + 4 * t * d_in * 4)                # residual / LN temporaries

    while vmem_est(tm_eff) > vmem_budget and tm_eff > row_align:
        tm_eff = max(row_align, _round_up(tm_eff // 2, row_align))
    grid_m = pl.cdiv(M, tm_eff)                    # ragged last block is masked

    x2d = x.reshape(M, d_in).astype(io_dtype)

    # --- weights cast once (outside the kernel) to the MXU dtype ---
    w1_p = w1.astype(param_dtype)
    w2_p = w2.astype(param_dtype)
    b1_2d = b1.reshape(1, d_hid).astype(jnp.float32)
    ln_pack = jnp.stack([b2, gamma, beta], axis=0).astype(jnp.float32)  # (3, d_in)

    vmem_limit = int(min(max(int(vmem_est(tm_eff) * 1.5) + (2 << 20), 8 << 20),
                         vmem_budget))

    cost = pl.CostEstimate(
        flops=4 * M * d_in * d_hid,                          # two matmuls
        transcendentals=M,                                   # rsqrt per row
        bytes_accessed=(2 * M * d_in * itemsize_x            # x in + out
                        + 2 * d_in * d_hid * itemsize_p      # W1 + W2
                        + (d_hid + 3 * d_in) * 4),           # biases / LN affine
    )

    const = lambda i: (0, 0)                       # grid-invariant operands

    out2d = pl.pallas_call(
        ffn_kernel,
        out_shape=jax.ShapeDtypeStruct((M, d_in), io_dtype),
        grid_spec=pltpu.PrefetchScalarGridSpec(
            num_scalar_prefetch=0,
            grid=(grid_m,),
            in_specs=[
                pl.BlockSpec((tm_eff, d_in), lambda i: (i, 0)),     # x tile
                pl.BlockSpec((d_in, d_hid), const,
                             pipeline_mode=pl.Buffered(1)),         # W1
                pl.BlockSpec((1, d_hid), const,
                             pipeline_mode=pl.Buffered(1)),         # b1
                pl.BlockSpec((d_hid, d_in), const,
                             pipeline_mode=pl.Buffered(1)),         # W2
                pl.BlockSpec((3, d_in), const,
                             pipeline_mode=pl.Buffered(1)),         # b2,gamma,beta
            ],
            out_specs=pl.BlockSpec((tm_eff, d_in), lambda i: (i, 0)),
        ),
        compiler_params=pltpu.CompilerParams(
            dimension_semantics=("parallel",),
            vmem_limit_bytes=vmem_limit,
        ),
        cost_estimate=cost,
    )(x2d, w1_p, b1_2d, w2_p, ln_pack)

    return out2d.reshape(B, S, d_in).astype(x.dtype)


def reference_ffn(x, w1, b1, w2, b2, gamma, beta):
    h = jnp.maximum(jnp.einsum("bsd,dh->bsh", x, w1) + b1, 0.0)
    y = jnp.einsum("bsh,hd->bsd", h, w2) + b2
    y = y + x
    mean = jnp.mean(y, axis=-1, keepdims=True)
    var = jnp.mean((y - mean) ** 2, axis=-1, keepdims=True)
    y = (y - mean) / jnp.sqrt(var + 1e-6)
    return y * gamma + beta


if __name__ == "__main__":
    B, S, d_in, d_hid = 2, 8, 32, 64

    key = jax.random.PRNGKey(0)
    kx, kw1, kb1, kw2, kb2 = jax.random.split(key, 5)

    x = jax.random.normal(kx, (B, S, d_in), dtype=jnp.float32)

    # Deterministic synthetic parameters (Linear: y = x @ W + b, W: (in, out))
    w1 = jax.random.normal(kw1, (d_in, d_hid), dtype=jnp.float32) * (1.0 / d_in) ** 0.5
    b1 = jax.random.normal(kb1, (d_hid,), dtype=jnp.float32) * 0.02
    w2 = jax.random.normal(kw2, (d_hid, d_in), dtype=jnp.float32) * (1.0 / d_hid) ** 0.5
    b2 = jax.random.normal(kb2, (d_in,), dtype=jnp.float32) * 0.02
    gamma = jnp.ones((d_in,), dtype=jnp.float32)
    beta = jnp.zeros((d_in,), dtype=jnp.float32)

    ref = reference_ffn(x, w1, b1, w2, b2, gamma, beta)

    # --- exact-precision path: f32 params, HIGHEST precision, tight tolerance ---
    out_f32 = positionwise_ffn(x, w1, b1, w2, b2, gamma, beta,
                               param_dtype=jnp.float32)
    out_f32 = jax.block_until_ready(out_f32)
    assert out_f32.shape == (B, S, d_in)
    assert jnp.allclose(out_f32, ref, atol=1e-4, rtol=1e-4), "f32 mismatch vs reference"

    # --- production fast path: bf16 weights on the MXU, f32 accum/LN ---
    out_bf16 = positionwise_ffn(x, w1, b1, w2, b2, gamma, beta,
                                param_dtype=jnp.bfloat16)
    out_bf16 = jax.block_until_ready(out_bf16)
    assert out_bf16.shape == (B, S, d_in)
    assert jnp.allclose(out_bf16, ref, atol=5e-2, rtol=5e-2), "bf16 mismatch vs reference"

    print("KERNEL_OK")
</pallas_src>

<mosaic_0001>
module attributes {stable_mosaic.version = 11 : i64} {
  func.func @ffn_kernel(%arg0: i32, %arg1: memref<8x32xf32, #tpu.memory_space<vmem>>, %arg2: memref<32x64xf32, #tpu.memory_space<vmem>>, %arg3: memref<1x64xf32, #tpu.memory_space<vmem>>, %arg4: memref<64x32xf32, #tpu.memory_space<vmem>>, %arg5: memref<3x32xf32, #tpu.memory_space<vmem>>, %arg6: memref<8x32xf32, #tpu.memory_space<vmem>>) attributes {dimension_semantics = [#tpu.dimension_semantics<parallel>], iteration_bounds = array<i64: 2>, scalar_prefetch = 0 : i64, scratch_operands = 0 : i64, tpu.core_type = #tpu.core_type<tc>, window_params = [{transform_indices = @transform_0, window_bounds = array<i64: 8, 32>}, {pipeline_mode = #tpu.pipeline_mode<synchronous>, transform_indices = @transform_1, window_bounds = array<i64: 32, 64>}, {pipeline_mode = #tpu.pipeline_mode<synchronous>, transform_indices = @transform_2, window_bounds = array<i64: 1, 64>}, {pipeline_mode = #tpu.pipeline_mode<synchronous>, transform_indices = @transform_3, window_bounds = array<i64: 64, 32>}, {pipeline_mode = #tpu.pipeline_mode<synchronous>, transform_indices = @transform_4, window_bounds = array<i64: 3, 32>}, {transform_indices = @transform_5, window_bounds = array<i64: 8, 32>}]} {
    %c0 = arith.constant 0 : index
    %c0_0 = arith.constant 0 : index
    %0 = vector.load %arg1[%c0, %c0_0] : memref<8x32xf32, #tpu.memory_space<vmem>>, vector<8x32xf32>
    %c0_1 = arith.constant 0 : index
    %c0_2 = arith.constant 0 : index
    %1 = vector.load %arg2[%c0_1, %c0_2] : memref<32x64xf32, #tpu.memory_space<vmem>>, vector<32x64xf32>
    %cst = arith.constant dense<0.000000e+00> : vector<8x64xf32>
    %2 = tpu.matmul %0, %1, %cst {dimension_numbers = #tpu.dot_dimension_numbers<[1], [0], [0], [1], [0, 0, 1, 1], [], []>, precision = #tpu.contract_precision<fp32>} : vector<8x32xf32>, vector<32x64xf32>, vector<8x64xf32> -> vector<8x64xf32>
    %c0_3 = arith.constant 0 : index
    %c0_4 = arith.constant 0 : index
    %3 = vector.load %arg3[%c0_3, %c0_4] : memref<1x64xf32, #tpu.memory_space<vmem>>, vector<1x64xf32>
    %4 = vector.broadcast %3 : vector<1x64xf32> to vector<8x64xf32>
    %5 = arith.addf %2, %4 : vector<8x64xf32>
    %cst_5 = arith.constant 0.000000e+00 : f32
    %6 = vector.broadcast %cst_5 : f32 to vector<8x64xf32>
    %7 = arith.maximumf %5, %6 : vector<8x64xf32>
    %c0_6 = arith.constant 0 : index
    %c0_7 = arith.constant 0 : index
    %8 = vector.load %arg4[%c0_6, %c0_7] : memref<64x32xf32, #tpu.memory_space<vmem>>, vector<64x32xf32>
    %cst_8 = arith.constant dense<0.000000e+00> : vector<8x32xf32>
    %9 = tpu.matmul %7, %8, %cst_8 {dimension_numbers = #tpu.dot_dimension_numbers<[1], [0], [0], [1], [0, 0, 1, 1], [], []>, precision = #tpu.contract_precision<fp32>} : vector<8x64xf32>, vector<64x32xf32>, vector<8x32xf32> -> vector<8x32xf32>
    %c0_9 = arith.constant 0 : index
    %c0_10 = arith.constant 0 : index
    %10 = vector.load %arg5[%c0_9, %c0_10] : memref<3x32xf32, #tpu.memory_space<vmem>>, vector<3x32xf32>
    %11 = vector.extract_strided_slice %10 {offsets = [0, 0], sizes = [1, 32], strides = [1, 1]} : vector<3x32xf32> to vector<1x32xf32>
    %12 = vector.broadcast %11 : vector<1x32xf32> to vector<8x32xf32>
    %13 = arith.addf %9, %12 : vector<8x32xf32>
    %14 = arith.addf %13, %0 : vector<8x32xf32>
    %cst_11 = arith.constant dense<0.000000e+00> : vector<8xf32>
    %15 = vector.multi_reduction <add>, %14, %cst_11 [1] : vector<8x32xf32> to vector<8xf32>
    %16 = vector.shape_cast %15 : vector<8xf32> to vector<8x1xf32>
    %cst_12 = arith.constant 3.200000e+01 : f32
    %17 = vector.broadcast %cst_12 : f32 to vector<8x1xf32>
    %18 = arith.divf %16, %17 : vector<8x1xf32>
    %19 = vector.broadcast %18 : vector<8x1xf32> to vector<8x32xf32>
    %20 = arith.subf %14, %19 : vector<8x32xf32>
    %21 = arith.mulf %20, %20 : vector<8x32xf32>
    %cst_13 = arith.constant dense<0.000000e+00> : vector<8xf32>
    %22 = vector.multi_reduction <add>, %21, %cst_13 [1] : vector<8x32xf32> to vector<8xf32>
    %23 = vector.shape_cast %22 : vector<8xf32> to vector<8x1xf32>
    %cst_14 = arith.constant 3.200000e+01 : f32
    %24 = vector.broadcast %cst_14 : f32 to vector<8x1xf32>
    %25 = arith.divf %23, %24 : vector<8x1xf32>
    %cst_15 = arith.constant 9.99999997E-7 : f32
    %26 = vector.broadcast %cst_15 : f32 to vector<8x1xf32>
    %27 = arith.addf %25, %26 : vector<8x1xf32>
    %28 = math.rsqrt %27 : vector<8x1xf32>
    %29 = vector.broadcast %28 : vector<8x1xf32> to vector<8x32xf32>
    %30 = arith.mulf %20, %29 : vector<8x32xf32>
    %31 = vector.extract_strided_slice %10 {offsets = [1, 0], sizes = [1, 32], strides = [1, 1]} : vector<3x32xf32> to vector<1x32xf32>
    %32 = vector.broadcast %31 : vector<1x32xf32> to vector<8x32xf32>
    %33 = arith.mulf %30, %32 : vector<8x32xf32>
    %34 = vector.extract_strided_slice %10 {offsets = [2, 0], sizes = [1, 32], strides = [1, 1]} : vector<3x32xf32> to vector<1x32xf32>
    %35 = vector.broadcast %34 : vector<1x32xf32> to vector<8x32xf32>
    %36 = arith.addf %33, %35 : vector<8x32xf32>
    %c0_16 = arith.constant 0 : index
    %c0_17 = arith.constant 0 : index
    %37 = vector.load %arg6[%c0_16, %c0_17] : memref<8x32xf32, #tpu.memory_space<vmem>>, vector<8x32xf32>
    tpu.vector_store %arg6[%c0_16, %c0_17], %36 {strides = array<i32>} : memref<8x32xf32, #tpu.memory_space<vmem>>, vector<8x32xf32>,
    return
  }
  func.func @transform_0(%arg0: i32) -> (i32, i32) {
    %c0_i32 = arith.constant 0 : i32
    %c0_i32_0 = arith.constant 0 : i32
    return %arg0, %c0_i32 : i32, i32
  }
  func.func @transform_1(%arg0: i32) -> (i32, i32) {
    %c0_i32 = arith.constant 0 : i32
    %c0_i32_0 = arith.constant 0 : i32
    %c0_i32_1 = arith.constant 0 : i32
    return %c0_i32, %c0_i32_0 : i32, i32
  }
  func.func @transform_2(%arg0: i32) -> (i32, i32) {
    %c0_i32 = arith.constant 0 : i32
    %c0_i32_0 = arith.constant 0 : i32
    %c0_i32_1 = arith.constant 0 : i32
    return %c0_i32, %c0_i32_0 : i32, i32
  }
  func.func @transform_3(%arg0: i32) -> (i32, i32) {
    %c0_i32 = arith.constant 0 : i32
    %c0_i32_0 = arith.constant 0 : i32
    %c0_i32_1 = arith.constant 0 : i32
    return %c0_i32, %c0_i32_0 : i32, i32
  }
  func.func @transform_4(%arg0: i32) -> (i32, i32) {
    %c0_i32 = arith.constant 0 : i32
    %c0_i32_0 = arith.constant 0 : i32
    %c0_i32_1 = arith.constant 0 : i32
    return %c0_i32, %c0_i32_0 : i32, i32
  }
  func.func @transform_5(%arg0: i32) -> (i32, i32) {
    %c0_i32 = arith.constant 0 : i32
    %c0_i32_0 = arith.constant 0 : i32
    return %arg0, %c0_i32 : i32, i32
  }
}

</mosaic_0001>

<bundles_post_ra>
// kernel: tpu_custom_call.1
= control target key start
LH: loop header
LB: loop body
LE: loop exit
PB: predicated region body
PF: predicated region fallthrough
CT: control target
= control target key end

     0   :  { %10 = vsyncpa [#allocation3], 0  ;;  %s2186_s0 = inlined_call_operand.vmem [shape: f32[16,32], index: 0, kind: input, shape index: {}]   ;;  %s2187_s1 = inlined_call_operand.vmem [shape: f32[32,64], index: 1, kind: input, shape index: {}]   ;;  %s2188_s2 = inlined_call_operand.vmem [shape: f32[1,64], index: 2, kind: input, shape index: {}]   ;;  %s2189_s3 = inlined_call_operand.vmem [shape: f32[64,32], index: 3, kind: input, shape index: {}]   ;;  %s2190_s4 = inlined_call_operand.vmem [shape: f32[3,32], index: 4, kind: input, shape index: {}]   ;;  %s2191_s5 = inlined_call_operand.hbm [shape: f32[16,32], index: 5, kind: output, shape index: {}]  }
   0x1   :  { %12 = vsyncpa [#allocation3 + $0x1], 0  ;;  %s1788_s18 = smov 0   ;;  %s1790_s19 = smov 0  }
   0x2   :  { %s1792_s20 = smov 0   ;;  %s1794_s21 = smov 0  }
   0x3 LB: > { %s1809_s22 = sadd.s32 4294967295, %s1753_s21   ;;  %s1375_s23 = sadd.s32 4294967294, %s1753_s21   ;;  %s1753_s21 = sphi %s1794_s21, %s2197_s21   ;;  %s1749_s20 = sphi %s1792_s20, %s2196_s20   ;;  %s1745_s19 = sphi %s1790_s19, %s2195_s19   ;;  %s1741_s18 = sphi %s1788_s18, %s2194_s18  }
   0x4   : > { %s1813_s24 = sadd.s32 1, %s1753_s21   ;;  %s135_s25 = sadd.s32 1, %s1749_s20 }
   0x5   : > { %s132_s26 = ssub.s32 %s1753_s21, %s1813_s24  ;;  %p145_p0 = scmp.ne.s32.totalorder %s1749_s20, %s1745_s19 }
   0x6   : > { %p133_p1 = scmp.eq.s32.totalorder %s132_s26, 0  ;;  %p146_p2 = scmp.eq.s32.totalorder %s1809_s22, 1 }
   0x7   : > { %p151_p3 = scmp.ne.s32.totalorder %s1745_s19, %s1741_s18  ;;  %p152_p4 = scmp.eq.s32.totalorder %s1375_s23, 1 }
   0x8   : > { %s1824_s27 = scalar_select %p133_p1, %s1749_s20, %s135_s25  }
   0x9   : > { %p1826_p5 = por %p146_p2, %p145_p0  ;;  %p1830_p6 = por %p152_p4, %p151_p3 }
   0xa   : > { %p1378_p7 = scmp.ge.s32.totalorder %s1753_s21, 1  ;;  %p189_p8 = scmp.lt.s32.totalorder %s1753_s21, 3 }
   0xc   : > { %p190_p9 = pnand %p1378_p7, %p189_p8 }
   0xd   : > { %p216_p10 = scmp.lt.s32.totalorder (!%p190_p9), %s1809_s22, 1  ;;  %s213_s6 = sand.u32 (!%p190_p9), 1, %s1745_s19  }
   0xe   : > { %193 = sbr.rel (%p190_p9) target bundleno = 818 (0x332), region = 40  ;;  %s1379_s7 = sshll.u32 (!%p190_p9), %s213_s6, 3 }
   0xf   : > { %s1383_s8 = sshll.u32 (!%p190_p9), %s1809_s22, 7  ;;  %s215_s9 = scalar_lea.vmem (!%p190_p9), [#allocation2], %s1379_s7 }
  0x10   : > { %s1316_s10 = sshll.u32 (!%p190_p9), %s215_s9, 4  ;;  %s1757_s16 = smov (!%p190_p9), [#allocation2]   ;;  %s1317_s10 = int_to_ptr.vmem [resolvable:$true] %s1316_s10 }
  0x11   : > { %s1693_s15 = scalar_lea.vmem (!%p190_p9), %s1317_s10, 128 }
  0x12   : > { %p1694_p11 = scmp.ne.s32.totalorder (!%p190_p9), %s1317_s10, %s1693_s15 }
  0x13   : > { %v224_v0 = vld [vmem:[%s2187_s1 + $0x18] sm:$0xff]  ;;  %v223_v1 = vld [vmem:[%s2187_s1 + $0x10] sm:$0xff]  ;;  %v222_v2 = vld [vmem:[%s2187_s1 + $0x8] sm:$0xff]  ;;  %v1755_v3 = vmov 0.0   ;;  %vm1756_vm0 = vmmov 0   ;;  %s217_s13 = scalar_select %p216_p10, %s1809_s22, 1 }
  0x14   : > { %1470 = vmatprep.subr.mxu0 %v1755_v3  ;;  %v1847_v4 = vand.u32 4294901760, %v224_v0  ;;  %1481 = vmatprep.subr.mxu1 %v1755_v3  ;;  %v1850_v5 = vand.u32 4294901760, %v223_v1  ;;  %v1852_v6 = vand.u32 4294901760, %v222_v2  ;;  %v221_v7 = vld [vmem:[%s2187_s1] sm:$0xff]  ;;  %vm232_vm1 = vcmask 261120   ;;  %v729_v32 = vld [vmem:[%s2189_s3 + $0x38] sm:$0xff]  ;;  %p1695_p12 = pnand %p1694_p11, %p1826_p5 }
  0x15   : > { %v1857_v8 = vand.u32 4294901760, %v221_v7  ;;  %1478 = vmatprep.mubr.msk.f32.mxu0 %vm1756_vm0, %v1755_v3  ;;  %1489 = vmatprep.mubr.msk.f32.mxu1 %vm1756_vm0, %v1755_v3  ;;  %s1380_s14 = sshll.u32 %s217_s13, 3  ;;  %v1941_v33 = vand.u32 4294901760, %v729_v32  ;;  %v728_v34 = vld [vmem:[%s2189_s3 + $0x30] sm:$0xff]  ;;  %v727_v37 = vld [vmem:[%s2189_s3 + $0x28] sm:$0xff]  ;;  %v726_v41 = vld [vmem:[%s2189_s3 + $0x20] sm:$0xff]  ;;  %s1314_s13 = scalar_lea.hbm %s2191_s5, %s1383_s8 }
  0x16   : > { %1471 = vmatpush3.msra.mxu0 %v1847_v4  ;;  %v341_v9 = vsub.f32 %v224_v0, %v1847_v4  ;;  %v1867_v10 = vsub.f32 %v223_v1, %v1850_v5  ;;  %v1870_v11 = vsub.f32 %v222_v2, %v1852_v6  ;;  %s219_s17 = scalar_lea.vmem %s2186_s0, %s1380_s14  ;;  %v1949_v36 = vand.u32 4294901760, %v728_v34  ;;  %v725_v46 = vld [vmem:[%s2189_s3 + $0x18] sm:$0xff]  ;;  %v724_v52 = vld [vmem:[%s2189_s3 + $0x10] sm:$0xff]  ;;  %v723_v58 = vld [vmem:[%s2189_s3 + $0x8] sm:$0xff]  ;;  %s1303_s14 = scalar_lea.sflag [#allocation3], %s213_s6 }
  0x17   : > { %1472 = vmatprep.subr.mxu0 %v1755_v3  ;;  %v1874_v12 = vsub.f32 %v221_v7, %v1857_v8  ;;  %v1884_v17 = vld [vmem:[%s219_s17] sm:$0xff]  ;;  %v1947_v35 = vsub.f32 %v729_v32, %v1941_v33  ;;  %v1960_v40 = vand.u32 4294901760, %v727_v37  ;;  %v1974_v45 = vand.u32 4294901760, %v726_v41  ;;  %p1696_p13 = pneg %p1695_p12  ;;  %s1697_s17 = sshll.u32 %s1757_s16, 4  ;;  %s1698_s17 = int_to_ptr.vmem [resolvable:$false] %s1697_s17 }
  0x18   : > { %v342_v13 = vand.u32 4294901760, %v341_v9  ;;  %1473 = vmatpush3.msra.mxu0 %v1850_v5  ;;  %v349_v14 = vand.u32 4294901760, %v1867_v10  ;;  %v356_v15 = vand.u32 4294901760, %v1870_v11  ;;  %v234_v21 = vsel %vm232_vm1, %v1884_v17, 0  ;;  %v722_v0 = vld [vmem:[%s2189_s3] sm:$0xff]  ;;  %s1699_s22 = scalar_lea.vmem %s1698_s17, 256  ;;  %p1700_p0 = scmp.lt.s32.totalorder %s1317_s10, %s1698_s17 }
  0x19   : > { %1474 = vmatprep.subr.mxu0 %v1755_v3  ;;  %v363_v16 = vand.u32 4294901760, %v1874_v12  ;;  %v305_v22 = vand.u32 4294901760, %v234_v21  ;;  %v841_v38 = vand.u32 4294901760, %v1947_v35  ;;  %v1958_v39 = vsub.f32 %v728_v34, %v1949_v36  ;;  %p1701_p1 = scmp.lt.s32.totalorder %s1699_s22, %s1693_s15 }
  0x1a   : > { %v343_v18 = vsub.f32 %v341_v9, %v342_v13  ;;  %v350_v19 = vsub.f32 %v1867_v10, %v349_v14  ;;  %1475 = vmatpush3.msra.mxu0 %v1852_v6  ;;  %v357_v20 = vsub.f32 %v1870_v11, %v356_v15  ;;  %v1972_v44 = vsub.f32 %v727_v37, %v1960_v40 }
  0x1b   : > { %1476 = vmatprep.subr.mxu0 %v1755_v3  ;;  %v364_v25 = vsub.f32 %v1874_v12, %v363_v16  ;;  %v306_v26 = vsub.f32 %v234_v21, %v305_v22  ;;  %v842_v42 = vsub.f32 %v1947_v35, %v841_v38  ;;  %v848_v43 = vand.u32 4294901760, %v1958_v39  ;;  %p1702_p2 = por %p1701_p1, %p1700_p0 }
  0x1c   : > { %v344_v23 = vand.u32 4294901760, %v343_v18  ;;  %v351_v24 = vand.u32 4294901760, %v350_v19  ;;  %1477 = vmatpush3.msra.mxu0 %v1857_v8  ;;  %v358_v27 = vand.u32 4294901760, %v357_v20  ;;  %v855_v49 = vand.u32 4294901760, %v1972_v44 }
  0x1d   : > { %1492 = vmatprep.subr.mxu0 %v1755_v3  ;;  %v307_v28 = vand.u32 4294901760, %v306_v26  ;;  %v365_v29 = vand.u32 4294901760, %v364_v25  ;;  %v843_v47 = vand.u32 4294901760, %v842_v42  ;;  %v849_v48 = vsub.f32 %v1958_v39, %v848_v43  ;;  %p1703_p3 = pnand %p1702_p2, %p1696_p13 }
  0x1e   : > { %1482 = vmatpush3.msra.mxu1 %v344_v23  ;;  %v1986_v50 = vsub.f32 %v726_v41, %v1974_v45  ;;  %v1989_v51 = vand.u32 4294901760, %v725_v46  ;;  %v856_v54 = vsub.f32 %v1972_v44, %v855_v49  ;;  %v1999_v56 = vand.u32 4294901760, %v724_v52 }
  0x1f   : > { %1483 = vmatprep.subr.mxu1 %v1755_v3  ;;  %v308_v30 = vsub.f32 %v306_v26, %v307_v28  ;;  %v850_v53 = vand.u32 4294901760, %v849_v48  ;;  %v2015_v62 = vand.u32 4294901760, %v723_v58  ;;  %vm735_vm2 = vcmask 523264  }
  0x20   : > { %1484 = vmatpush3.msra.mxu1 %v351_v24  ;;  %v862_v55 = vand.u32 4294901760, %v1986_v50  ;;  %v2003_v57 = vsub.f32 %v725_v46, %v1989_v51  ;;  %v857_v59 = vand.u32 4294901760, %v856_v54  ;;  %v2013_v61 = vsub.f32 %v724_v52, %v1999_v56 }
  0x21   : > { %1485 = vmatprep.subr.mxu1 %v1755_v3  ;;  %v309_v31 = vand.u32 4294901760, %v308_v30 }
  0x22   : > { %1486 = vmatpush3.msra.mxu1 %v358_v27  ;;  %v863_v60 = vsub.f32 %v1986_v50, %v862_v55  ;;  %v869_v63 = vand.u32 4294901760, %v2003_v57  ;;  %v876_v2 = vand.u32 4294901760, %v2013_v61 }
  0x23   : > { %1487 = vmatprep.subr.mxu1 %v1755_v3  ;;  %1479 = vmatmul.mubr.f32.vlgmr.msra.gmra.mxu0 %v309_v31 }
  0x24   : > { %1488 = vmatpush3.msra.mxu1 %v365_v29  ;;  %1493 = vmatpush3.msra.mxu0 %v341_v9  ;;  %v864_v1 = vand.u32 4294901760, %v863_v60  ;;  %v877_v7 = vsub.f32 %v2013_v61, %v876_v2 }
  0x25   : > { %1490 = vmatmul.mubr.f32.vlgmr.msra.gmra.mxu1 %v305_v22  ;;  %1503 = vmatprep.subr.mxu1 %v1755_v3 }
  0x26   : > { %1494 = vmatprep.subr.mxu0 %v1755_v3  ;;  %1504 = vmatpush3.msra.mxu1 %v1847_v4 }
  0x27   : > { %1495 = vmatpush3.msra.mxu0 %v1867_v10  ;;  %1505 = vmatprep.subr.mxu1 %v1755_v3 }
  0x28   : > { %1496 = vmatprep.subr.mxu0 %v1755_v3  ;;  %1506 = vmatpush3.msra.mxu1 %v1850_v5 }
  0x29   : > { %1497 = vmatpush3.msra.mxu0 %v1870_v11  ;;  %1507 = vmatprep.subr.mxu1 %v1755_v3  ;;  %v878_v11 = vand.u32 4294901760, %v877_v7 }
  0x2a   : > { %1498 = vmatprep.subr.mxu0 %v1755_v3  ;;  %1508 = vmatpush3.msra.mxu1 %v1852_v6 }
  0x2b   : > { %1499 = vmatpush3.msra.mxu0 %v1874_v12  ;;  %1500 = vmatprep.mubr.msk.f32.mxu0 %vm1756_vm0, %v1755_v3 }
  0x2c   : > { %1509 = vmatprep.subr.mxu1 %v1755_v3  ;;  %1501 = vmatmul.mubr.f32.vlgmr.msra.gmra.mxu0 %v306_v26 }
  0x2d   : > { %1510 = vmatpush3.msra.mxu1 %v1857_v8  ;;  %1511 = vmatprep.mubr.msk.f32.mxu1 %vm1756_vm0, %v1755_v3 }
  0x2e   : > { %1514 = vmatprep.subr.mxu0 %v1755_v3  ;;  %1512 = vmatmul.mubr.f32.vlgmr.msra.gmra.mxu1 %v307_v28 }
  0x2f   : > { %1515 = vmatpush3.msra.mxu0 %v342_v13  ;;  %1525 = vmatprep.subr.mxu1 %v1755_v3 }
  0x30   : > { %1516 = vmatprep.subr.mxu0 %v1755_v3  ;;  %1526 = vmatpush3.msra.mxu1 %v1847_v4  ;;  %v2026_v4 = vsub.f32 %v723_v58, %v2015_v62 }
  0x31   : > { %1517 = vmatpush3.msra.mxu0 %v349_v14  ;;  %1527 = vmatprep.subr.mxu1 %v1755_v3 }
  0x32   : > { %1518 = vmatprep.subr.mxu0 %v1755_v3  ;;  %1528 = vmatpush3.msra.mxu1 %v1850_v5  ;;  %v2028_v5 = vand.u32 4294901760, %v722_v0 }
  0x33   : > { %1519 = vmatpush3.msra.mxu0 %v356_v15  ;;  %1529 = vmatprep.subr.mxu1 %v1755_v3 }
  0x34   : > { %1520 = vmatprep.subr.mxu0 %v1755_v3  ;;  %1530 = vmatpush3.msra.mxu1 %v1852_v6  ;;  %v870_v6 = vsub.f32 %v2003_v57, %v869_v63  ;;  %v2041_v9 = vsub.f32 %v722_v0, %v2028_v5 }
  0x35   : > { %1521 = vmatpush3.msra.mxu0 %v363_v16  ;;  %1522 = vmatprep.mubr.msk.f32.mxu0 %vm1756_vm0, %v1755_v3 }
  0x36   : > { %1531 = vmatprep.subr.mxu1 %v1755_v3  ;;  %1523 = vmatmul.mubr.f32.vlgmr.msra.gmra.mxu0 %v305_v22  ;;  %v871_v10 = vand.u32 4294901760, %v870_v6  ;;  %v890_v13 = vand.u32 4294901760, %v2041_v9 }
  0x37   : > { %1532 = vmatpush3.msra.mxu1 %v1857_v8  ;;  %1533 = vmatprep.mubr.msk.f32.mxu1 %vm1756_vm0, %v1755_v3  ;;  %v883_v8 = vand.u32 4294901760, %v2026_v4 }
  0x38   : > { %1534 = vmatmul.mubr.f32.vlgmr.msra.gmra.mxu1 %v305_v22  ;;  %1555 = vmatprep.subr.mxu1 %v1755_v3  ;;  %v891_v15 = vsub.f32 %v2041_v9, %v890_v13  ;;  %v1381_v22 = vld [vmem:[%s2188_s2] ss:$0 sm:$0xff] }
  0x39   : > { %1536 = vmatprep.subr.mxu0 %v1755_v3  ;;  %1571 = vmatprep.mubr.msk.f32.mxu1 %vm1756_vm0, %v1755_v3  ;;  %v884_v12 = vsub.f32 %v2026_v4, %v883_v8 }
  0x3a   : > { %1552 = vmatprep.mubr.msk.f32.mxu0 %vm1756_vm0, %v1755_v3  ;;  %1537 = vmatpush3.msra.mxu0 %v1941_v33  ;;  %v892_v16 = vand.u32 4294901760, %v891_v15 }
  0x3b   : > { %1538 = vmatprep.subr.mxu0 %v1755_v3  ;;  %1556 = vmatpush3.msra.mxu1 %v843_v47  ;;  %v885_v14 = vand.u32 4294901760, %v884_v12 }
  0x3c   : > { %1539 = vmatpush3.msra.mxu0 %v1949_v36  ;;  %1557 = vmatprep.subr.mxu1 %v1755_v3 }
  0x3d   : > { %1540 = vmatprep.subr.mxu0 %v1755_v3  ;;  %1558 = vmatpush3.msra.mxu1 %v850_v53 }
  0x3e   : > { %1541 = vmatpush3.msra.mxu0 %v1960_v40  ;;  %1559 = vmatprep.subr.mxu1 %v1755_v3 }
  0x3f   : > { %1542 = vmatprep.subr.mxu0 %v1755_v3  ;;  %1560 = vmatpush3.msra.mxu1 %v857_v59 }
  0x40   : > { %1543 = vmatpush3.msra.mxu0 %v1974_v45  ;;  %1561 = vmatprep.subr.mxu1 %v1755_v3 }
  0x41   : > { %1544 = vmatprep.subr.mxu0 %v1755_v3  ;;  %1562 = vmatpush3.msra.mxu1 %v864_v1 }
  0x42   : > { %1545 = vmatpush3.msra.mxu0 %v1989_v51  ;;  %1563 = vmatprep.subr.mxu1 %v1755_v3 }
  0x43   : > { %1546 = vmatprep.subr.mxu0 %v1755_v3  ;;  %1564 = vmatpush3.msra.mxu1 %v871_v10 }
  0x44   : > { %1547 = vmatpush3.msra.mxu0 %v1999_v56  ;;  %1565 = vmatprep.subr.mxu1 %v1755_v3 }
  0x45   : > { %1548 = vmatprep.subr.mxu0 %v1755_v3  ;;  %1566 = vmatpush3.msra.mxu1 %v878_v11 }
  0x46   : > { %1549 = vmatpush3.msra.mxu0 %v2015_v62  ;;  %1567 = vmatprep.subr.mxu1 %v1755_v3 }
  0x47   : > { %1550 = vmatprep.subr.mxu0 %v1755_v3  ;;  %1568 = vmatpush3.msra.mxu1 %v885_v14 }
  0x48   : > { %1551 = vmatpush3.msra.mxu0 %v2028_v5  ;;  %1569 = vmatprep.subr.mxu1 %v1755_v3 }
  0x49   : > { %1574 = vmatprep.subr.mxu0 %v1755_v3  ;;  %1570 = vmatpush3.msra.mxu1 %v892_v16 }
  0x4a   : > { %1593 = vmatprep.subr.mxu1 %v1755_v3 }
  0xe3   : > { %v311_v18 = vpop.f32.mrf.mxu0 }
  0xe4   : > { %v312_v23 = vadd.f32 %v1381_v22, %v311_v18 }
  0xe5   : > { %v402_v19 = vpop.f32.mrf.mxu1  ;;  %v1480_v20 = vpop.f32.mrf.mxu0 }
  0xe6   : > { %v403_v27 = vadd.f32 %v402_v19, %v312_v23 }
  0xe7   : > { %v1491_v21 = vpop.f32.mrf.mxu1 }
  0xec   : > { %v482_v24 = vpop.f32.mrf.mxu0 }
  0xed   : > { %v483_v29 = vadd.f32 %v482_v24, %v403_v27 }
  0xee   : > { %v559_v25 = vpop.f32.mrf.mxu1  ;;  %v1502_v26 = vpop.f32.mrf.mxu0 }
  0xef   : > { %v560_v30 = vadd.f32 %v559_v25, %v483_v29 }
  0xf0   : > { %v1513_v28 = vpop.f32.mrf.mxu1 }
  0xf6   : > { %v642_v31 = vpop.f32.mrf.mxu0 }
  0xf7   : > { %v643_v32 = vadd.f32 %v642_v31, %v560_v30 }
  0xf8   : > { %v717_v34 = vpop.f32.mrf.mxu1  ;;  %v1524_v37 = vpop.f32.mrf.mxu0 }
  0xf9   : > { %v718_v41 = vadd.f32 %v717_v34, %v643_v32 }
  0xfa   : > { %v1535_v42 = vpop.f32.mrf.mxu1 }
  0xfb   : > { %v721_v46 = vmax.f32 %v718_v41, 0.0 }
  0xfd   : > { %v737_v47 = vsel %vm735_vm2, %v721_v46, 0 }
  0xfe   : > { %v2061_v48 = vand.u32 4294901760, %v737_v47 }
 0x100   : > { %v813_v52 = vsub.f32 %v737_v47, %v2061_v48  ;;  %1572 = vmatmul.mubr.f32.vlgmr.msra.gmra.mxu1 %v2061_v48 }
 0x101   : > { %1594 = vmatpush3.msra.mxu1 %v1941_v33  ;;  %1609 = vmatprep.mubr.msk.f32.mxu1 %vm1756_vm0, %v1755_v3 }
 0x102   : > { %v814_v53 = vand.u32 4294901760, %v813_v52  ;;  %1595 = vmatprep.subr.mxu1 %v1755_v3 }
 0x103   : > { %1596 = vmatpush3.msra.mxu1 %v1949_v36 }
 0x104   : > { %1597 = vmatprep.subr.mxu1 %v1755_v3  ;;  %v815_v54 = vsub.f32 %v813_v52, %v814_v53 }
 0x105   : > { %1598 = vmatpush3.msra.mxu1 %v1960_v40 }
 0x106   : > { %1599 = vmatprep.subr.mxu1 %v1755_v3  ;;  %v816_v58 = vand.u32 4294901760, %v815_v54 }
 0x107   : > { %1600 = vmatpush3.msra.mxu1 %v1974_v45 }
 0x108   : > { %1601 = vmatprep.subr.mxu1 %v1755_v3  ;;  %1553 = vmatmul.mubr.f32.vlgmr.msra.gmra.mxu0 %v816_v58 }
 0x109   : > { %1575 = vmatpush3.msra.mxu0 %v1947_v35  ;;  %1602 = vmatpush3.msra.mxu1 %v1989_v51 }
 0x10a   : > { %1576 = vmatprep.subr.mxu0 %v1755_v3  ;;  %1603 = vmatprep.subr.mxu1 %v1755_v3 }
 0x10b   : > { %1577 = vmatpush3.msra.mxu0 %v1958_v39  ;;  %1604 = vmatpush3.msra.mxu1 %v1999_v56  ;;  %v730_v39 = vld [vmem:[%s2190_s4] sm:$0x7] }
 0x10c   : > { %1578 = vmatprep.subr.mxu0 %v1755_v3  ;;  %1605 = vmatprep.subr.mxu1 %v1755_v3 }
 0x10d   : > { %1579 = vmatpush3.msra.mxu0 %v1972_v44  ;;  %1606 = vmatpush3.msra.mxu1 %v2015_v62 }
 0x10e   : > { %1580 = vmatprep.subr.mxu0 %v1755_v3  ;;  %1607 = vmatprep.subr.mxu1 %v1755_v3 }
 0x10f   : > { %1581 = vmatpush3.msra.mxu0 %v1986_v50  ;;  %1608 = vmatpush3.msra.mxu1 %v2028_v5 }
 0x110   : > { %1582 = vmatprep.subr.mxu0 %v1755_v3  ;;  %1610 = vmatmul.mubr.f32.vlgmr.msra.gmra.mxu1 %v814_v53 }
 0x111   : > { %1631 = vmatprep.subr.mxu1 %v1755_v3  ;;  %1583 = vmatpush3.msra.mxu0 %v2003_v57 }
 0x112   : > { %1632 = vmatpush3.msra.mxu1 %v1941_v33  ;;  %1584 = vmatprep.subr.mxu0 %v1755_v3  ;;  %v731_v33 = vlaneseq }
 0x113   : > { %1633 = vmatprep.subr.mxu1 %v1755_v3  ;;  %1585 = vmatpush3.msra.mxu0 %v2013_v61 }
 0x114   : > { %1634 = vmatpush3.msra.mxu1 %v1949_v36  ;;  %1586 = vmatprep.subr.mxu0 %v1755_v3  ;;  %v732_v35 = vshrl.u32 %v731_v33, 7 }
 0x115   : > { %1635 = vmatprep.subr.mxu1 %v1755_v3  ;;  %1587 = vmatpush3.msra.mxu0 %v2026_v4 }
 0x116   : > { %1636 = vmatpush3.msra.mxu1 %v1960_v40  ;;  %1588 = vmatprep.subr.mxu0 %v1755_v3  ;;  %v1293_v36 = vsub.s32 1, %v732_v35 }
 0x117   : > { %1637 = vmatprep.subr.mxu1 %v1755_v3  ;;  %1589 = vmatpush3.msra.mxu0 %v2041_v9 }
 0x118   : > { %1590 = vmatprep.mubr.msk.f32.mxu0 %vm1756_vm0, %v1755_v3  ;;  %1638 = vmatpush3.msra.mxu1 %v1974_v45  ;;  %v1294_v40 = vrot.slane %v730_v39, %v1293_v36 }
 0x119   : > { %1591 = vmatmul.mubr.f32.vlgmr.msra.gmra.mxu0 %v813_v52  ;;  %1612 = vmatprep.subr.mxu0 %v1755_v3 }
 0x11a   : > { %1639 = vmatprep.subr.mxu1 %v1755_v3  ;;  %1613 = vmatpush3.msra.mxu0 %v841_v38  ;;  %v1298_v38 = vsub.s32 2, %v732_v35 }
 0x11b   : > { %1640 = vmatpush3.msra.mxu1 %v1989_v51  ;;  %1614 = vmatprep.subr.mxu0 %v1755_v3 }
 0x11c   : > { %1641 = vmatprep.subr.mxu1 %v1755_v3  ;;  %1615 = vmatpush3.msra.mxu0 %v848_v43  ;;  %v1299_v43 = vrot.slane %v730_v39, %v1298_v38 }
 0x11d   : > { %1642 = vmatpush3.msra.mxu1 %v1999_v56  ;;  %1616 = vmatprep.subr.mxu0 %v1755_v3 }
 0x11e   : > { %1643 = vmatprep.subr.mxu1 %v1755_v3  ;;  %1617 = vmatpush3.msra.mxu0 %v855_v49 }
 0x11f   : > { %1644 = vmatpush3.msra.mxu1 %v2015_v62  ;;  %1618 = vmatprep.subr.mxu0 %v1755_v3 }
 0x120   : > { %1645 = vmatprep.subr.mxu1 %v1755_v3  ;;  %1619 = vmatpush3.msra.mxu0 %v862_v55  ;;  %v733_v55 = vsub.s32 0, %v732_v35 }
 0x121   : > { %1646 = vmatpush3.msra.mxu1 %v2028_v5  ;;  %1647 = vmatprep.mubr.msk.f32.mxu1 %vm1756_vm0, %v1755_v3 }
 0x122   : > { %1620 = vmatprep.subr.mxu0 %v1755_v3  ;;  %1648 = vmatmul.mubr.f32.vlgmr.msra.gmra.mxu1 %v2061_v48  ;;  %v734_v57 = vrot.slane %v730_v39, %v733_v55 }
 0x123   : > { %1621 = vmatpush3.msra.mxu0 %v869_v63  ;;  %1628 = vmatprep.mubr.msk.f32.mxu0 %vm1756_vm0, %v1755_v3 }
 0x124   : > { %1622 = vmatprep.subr.mxu0 %v1755_v3 }
 0x125   : > { %1623 = vmatpush3.msra.mxu0 %v876_v2 }
 0x126   : > { %1624 = vmatprep.subr.mxu0 %v1755_v3 }
 0x127   : > { %1625 = vmatpush3.msra.mxu0 %v883_v8 }
 0x128   : > { %1626 = vmatprep.subr.mxu0 %v1755_v3 }
 0x129   : > { %1627 = vmatpush3.msra.mxu0 %v890_v13 }
 0x12a   : > { %1629 = vmatmul.mubr.f32.vlgmr.msra.gmra.mxu0 %v2061_v48 }
 0x1c0   : > { %v929_v44 = vpop.f32.mrf.mxu1 }
 0x1c2   : > { %v1573_v45 = vpop.f32.mrf.mxu1 }
 0x1c8   : > { %v818_v49 = vpop.f32.mrf.mxu0 }
 0x1c9   : > { %v819_v60 = vadd.f32 %v818_v49, %v734_v57 }
 0x1ca   : > { %v1554_v50 = vpop.f32.mrf.mxu0 }
 0x1cb   : > { %v930_v62 = vadd.f32 %v929_v44, %v819_v60 }
 0x1d0   : > { %v1098_v3 = vpop.f32.mrf.mxu1 }
 0x1d2   : > { %v1611_v51 = vpop.f32.mrf.mxu1 }
 0x1d9   : > { %v1017_v56 = vpop.f32.mrf.mxu0 }
 0x1da   : > { %v1018_v0 = vadd.f32 %v1017_v56, %v930_v62 }
 0x1db   : > { %v1592_v59 = vpop.f32.mrf.mxu0 }
 0x1dc   : > { %v1099_v1 = vadd.f32 %v1098_v3, %v1018_v0 }
 0x1e2   : > { %v1272_v61 = vpop.f32.mrf.mxu1 }
 0x1e4   : > { %v1649_v63 = vpop.f32.mrf.mxu1 }
 0x1ea   : > { %v1193_v2 = vpop.f32.mrf.mxu0 }
 0x1eb   : > { %v1194_v4 = vadd.f32 %v1193_v2, %v1099_v1 }
 0x1ec   : > { %v1630_v5 = vpop.f32.mrf.mxu0 }
 0x1ed   : > { %v1273_v6 = vadd.f32 %v1272_v61, %v1194_v4 }
 0x1ef   : > { %v1276_v7 = vadd.f32 %v1273_v6, %v1884_v17 }
 0x1f1   : > { %v1277_v8 = vsel %vm232_vm1, %v1276_v7, 0.0 }
 0x1f2   : > { %1278 = vadd.xlane.f32.xlu0 %v1277_v8 }
 0x27b   : > { %v1279_v9 = vpop.xlane.xlu0 %1278 }
 0x27c   : > { %v1281_v10 = vmul.f32 0.03125, %v1279_v9 }
 0x27e   : > { %v1282_v11 = vsub.f32 %v1276_v7, %v1281_v10 }
 0x280   : > { %v1283_v12 = vmul.f32 %v1282_v11, %v1282_v11 }
 0x282   : > { %v1284_v13 = vsel %vm232_vm1, %v1283_v12, 0.0 }
 0x283   : > { %1285 = vadd.xlane.f32.xlu0 %v1284_v13 }
 0x30c   : > { %v1286_v14 = vpop.xlane.xlu0 %1285 }
 0x30d   : > { %v1287_v15 = vmul.f32 0.03125, %v1286_v14 }
 0x30f   : > { %v1288_v16 = vadd.f32 1e-06, %v1287_v15 }
 0x311   : > { %1691 = vrsqrt.f32 %v1288_v16 }
 0x31e   : > { %v1692_v18 = vpop.eup %1691 }
 0x31f   : > { %v1290_v17 = vmul.f32 %v1692_v18, %v1282_v11 }
 0x321   : > { %v1295_v19 = vmul.f32 %v1294_v40, %v1290_v17 }
 0x323   : > { %v1300_v20 = vadd.f32 %v1299_v43, %v1295_v19 }
 0x325   : > { %1301 = vst.msk [vmem:[%s215_s9] sm:$0xff] %vm232_vm1, %v1300_v20 }
 0x326   : > { %1706 = shalt.err (!%p1703_p3)
}
 0x327   : > { %s1707_s23 = scalar_lea.hbm %s1314_s13, 128  ;;  %s1711_s30 = scalar_lea.hbm %s2191_s5, 256 }
 0x328   : > { %p1708_p4 = scmp.ne.s32.totalorder %s1314_s13, %s1707_s23  ;;  %p1712_p9 = scmp.lt.s32.totalorder %s1314_s13, %s2191_s5 }
 0x329   : > { %p1713_p10 = scmp.lt.s32.totalorder %s1711_s30, %s1707_s23 }
 0x32a   : > { %p1709_p7 = pnand %p1708_p4, %p1826_p5 }
 0x32b   : > { %p1714_p11 = por %p1713_p10, %p1712_p9 }
 0x32c   : > { %p1710_p8 = pneg %p1709_p7 }
 0x32e   : > { %p1715_p12 = pnand %p1714_p11, %p1710_p8 }
 0x330   : > { %1718 = shalt.err (!%p1715_p12)
}
 0x331   : > { %1650 = dma.vmem_to_hbm [thread:$0]  (%p1826_p5), %s1317_s10, 128, %s1314_s13, %s1303_s14  }
 0x332 PF: > { %p1656_p13 = scmp.ge.s32.totalorder %s1753_s21, 2  ;;  %s1328_s8 = sand.u32 1, %s1741_s18  }
 0x333   : > { %s1329_s9 = scalar_lea.sflag [#allocation3], %s1328_s8 }
 0x334   : > { %p1653_p0 = pnand %p1656_p13, %p1830_p6 }
 0x336   : > { %p1654_p1 = pneg %p1653_p0 }
 0x338   : > { %1736 = dma.done.wait (%p1654_p1), %s1329_s9, 128  }
 0x339   : > { %1738 = vsyncadd (%p1654_p1), %s1329_s9, 4294967168  ;;  %p15_p2 = scmp.ge.s32.totalorder %s1813_s24, 4   ;;  %s2194_s18 = smov %s1745_s19 }
 0x33a   : > { %s2195_s19 = smov %s1749_s20  ;;  %s2196_s20 = smov %s1824_s27 }
 0x33b   : > { %s2197_s21 = smov %s1813_s24  ;;  %17 = sbr.rel (!%p15_p2) target bundleno = 3 (0x3), region = 75 }
 0x340   :  { %1334 = vsyncpa [#allocation3], 1 }
 0x341   :  { %1336 = vsyncpa [#allocation3 + $0x1], 1 }

</bundles_post_ra>
